<compile_context>
chip_gen: v7x
topology: tpu7x:2x2x1
jax: 0.10.0
libtpu: 0.0.40
codegen_flags: <defaults>
</compile_context>

<pallas_src>
import jax
import jax.numpy as jnp
from jax.experimental import pallas as pl
from jax.experimental.pallas import tpu as pltpu


def _round_up(x, m):
    return ((x + m - 1) // m) * m


def _make_kernel(n_layers):
    """One (tb, D_in) batch tile through the whole tower; params stay VMEM-resident."""

    def kernel(x_ref, *refs):
        o_ref = refs[-1]
        p = refs[:-1]                       # n_layers * (W_folded, shift)
        h = x_ref[...]                      # streamed dtype (f32 or bf16)
        for i in range(n_layers):           # layers are sequentially dependent
            w = p[2 * i][...]               # (D_prev, D_i)  -- BN scale pre-folded in
            t = p[2 * i + 1][...]           # (1, D_i) f32   -- (bias - mean) * inv_std
            z = jnp.dot(h, w, preferred_element_type=jnp.float32)   # MXU, f32 acc
            h = jnp.maximum(z + t, 0.0)                              # BN shift + ReLU (VPU)
            if i + 1 < n_layers:
                h = h.astype(w.dtype)       # keep the streaming dtype for the next matmul
        o_ref[...] = h.astype(o_ref.dtype)

    return kernel


def deep_network(x, weights, biases, running_means, running_vars,
                 *, eps=1e-5, tb=2048, stream_dtype=None):
    """DeepNetwork forward.

    x:             (B, D_in)
    weights[i]:    (D_{i-1}, D_i)   -- nn.Linear weight already transposed (in, out)
    biases[i]:     (D_i,)
    running_*[i]:  (D_i,)           -- BatchNorm1d(affine=False) running statistics
    stream_dtype:  optional dtype (e.g. jnp.bfloat16) used to stream x / W through HBM;
                   accumulation and BN shift remain f32. None = keep x's dtype.
    Returns (B, D_last) in x's original dtype.
    """
    B, d_in = x.shape
    n_layers = len(weights)
    d_out = weights[-1].shape[1]
    out_dtype = x.dtype
    w_dtype = stream_dtype if stream_dtype is not None else x.dtype

    # Fold Linear bias + eval-mode BatchNorm1d(affine=False) into the weights:
    #   ((x @ W + b) - mean) * inv_std == x @ (W * inv_std) + (b - mean) * inv_std
    params = []
    for w, b, m, v in zip(weights, biases, running_means, running_vars):
        inv_std = jax.lax.rsqrt(v.astype(jnp.float32) + eps)
        w_folded = (w.astype(jnp.float32) * inv_std[None, :]).astype(w_dtype)
        shift = ((b.astype(jnp.float32) - m.astype(jnp.float32)) * inv_std).reshape(1, -1)
        params += [w_folded, shift]

    if x.dtype != w_dtype:
        x = x.astype(w_dtype)

    # ---- batch-tile selection (no padding: ragged last tile is handled by Pallas) ----
    tile = 16  # sublane-packing granularity (covers bf16; also valid for f32)
    tb = min(_round_up(max(tb, tile), tile), _round_up(B, tile))
    if pl.cdiv(B, tb) < 2 and B > tile:           # >=2 grid steps -> both v7x TCs busy
        tb = max(tile, _round_up(pl.cdiv(B, 2), tile))
    n_tiles = pl.cdiv(B, tb)
    if n_tiles > 1 and n_tiles % 2 == 1:          # prefer an even tile count (megacore balance)
        alt = _round_up(pl.cdiv(B, n_tiles + 1), tile)
        if alt >= 128 and pl.cdiv(B, alt) % 2 == 0:
            tb = alt
    grid = (pl.cdiv(B, tb),)

    in_specs = [pl.BlockSpec((tb, d_in), lambda i: (i, 0))]        # batch tile of x
    for arr in params:
        # Full-array block, constant index -> fetched once, resident in VMEM.
        in_specs.append(pl.BlockSpec(arr.shape, lambda i: (0, 0)))

    out = pl.pallas_call(
        _make_kernel(n_layers),
        out_shape=jax.ShapeDtypeStruct((B, d_out), out_dtype),
        grid_spec=pltpu.PrefetchScalarGridSpec(
            num_scalar_prefetch=0,
            grid=grid,
            in_specs=in_specs,
            out_specs=pl.BlockSpec((tb, d_out), lambda i: (i, 0)),
        ),
        compiler_params=pltpu.CompilerParams(
            dimension_semantics=("parallel",),     # shards batch tiles across TCs (v7x)
            vmem_limit_bytes=32 * 1024 * 1024,     # safe on v5e/v6e/v7x; covers large tb
        ),
    )(x, *params)
    return out


def deep_network_ref(x, weights, biases, running_means, running_vars, eps=1e-5):
    """Pure-JAX reference mirroring the PyTorch forward literally (eval-mode BN)."""
    h = x.astype(jnp.float32)
    for w, b, m, v in zip(weights, biases, running_means, running_vars):
        z = h @ w.astype(jnp.float32) + b.astype(jnp.float32)          # Linear
        z = (z - m) / jnp.sqrt(v.astype(jnp.float32) + eps)            # BN, affine=False
        h = jnp.maximum(z, 0.0)                                        # ReLU
    return h.astype(x.dtype)


if __name__ == "__main__":
    # Module config: DeepNetwork(n_input_feat=128, n_layers=[64, 32]).
    n_input_feat = 128
    layer_units = [64, 32]
    B = 256          # small demo batch; tile heuristic picks tb=128 -> 2 parallel grid steps

    key = jax.random.PRNGKey(0)
    kx, *kp = jax.random.split(key, 1 + 4 * len(layer_units))

    x = jax.random.normal(kx, (B, n_input_feat), dtype=jnp.float32)

    weights, biases, running_means, running_vars = [], [], [], []
    d_prev = n_input_feat
    for li, d in enumerate(layer_units):
        kw, kb, km, kv = kp[4 * li: 4 * li + 4]
        # nn.Linear weight is (out, in); store it transposed as (in, out) for x @ W.
        weights.append(jax.random.normal(kw, (d_prev, d), dtype=jnp.float32)
                       * (1.0 / jnp.sqrt(d_prev)))
        biases.append(jax.random.normal(kb, (d,), dtype=jnp.float32) * 0.1)
        # BatchNorm1d(affine=False) running statistics (eval-mode forward).
        running_means.append(jax.random.normal(km, (d,), dtype=jnp.float32) * 0.1)
        running_vars.append(jax.random.uniform(kv, (d,), dtype=jnp.float32,
                                               minval=0.5, maxval=1.5))
        d_prev = d

    out = deep_network(x, weights, biases, running_means, running_vars)
    out = jax.block_until_ready(out)

    ref = deep_network_ref(x, weights, biases, running_means, running_vars)
    assert out.shape == (B, layer_units[-1])
    assert jnp.allclose(out, ref, rtol=5e-4, atol=5e-4), "mismatch vs reference"

    print("KERNEL_OK")
</pallas_src>

<mosaic_0001>
module attributes {stable_mosaic.version = 11 : i64} {
  func.func @kernel(%arg0: i32, %arg1: memref<128x128xf32, #tpu.memory_space<vmem>>, %arg2: memref<128x64xf32, #tpu.memory_space<vmem>>, %arg3: memref<1x64xf32, #tpu.memory_space<vmem>>, %arg4: memref<64x32xf32, #tpu.memory_space<vmem>>, %arg5: memref<1x32xf32, #tpu.memory_space<vmem>>, %arg6: memref<128x32xf32, #tpu.memory_space<vmem>>) attributes {dimension_semantics = [#tpu.dimension_semantics<parallel>], iteration_bounds = array<i64: 2>, scalar_prefetch = 0 : i64, scratch_operands = 0 : i64, tpu.core_type = #tpu.core_type<tc>, window_params = [{transform_indices = @transform_0, window_bounds = array<i64: 128, 128>}, {pipeline_mode = #tpu.pipeline_mode<synchronous>, transform_indices = @transform_1, window_bounds = array<i64: 128, 64>}, {pipeline_mode = #tpu.pipeline_mode<synchronous>, transform_indices = @transform_2, window_bounds = array<i64: 1, 64>}, {pipeline_mode = #tpu.pipeline_mode<synchronous>, transform_indices = @transform_3, window_bounds = array<i64: 64, 32>}, {pipeline_mode = #tpu.pipeline_mode<synchronous>, transform_indices = @transform_4, window_bounds = array<i64: 1, 32>}, {transform_indices = @transform_5, window_bounds = array<i64: 128, 32>}]} {
    %c0 = arith.constant 0 : index
    %c0_0 = arith.constant 0 : index
    %0 = vector.load %arg1[%c0, %c0_0] : memref<128x128xf32, #tpu.memory_space<vmem>>, vector<128x128xf32>
    %c0_1 = arith.constant 0 : index
    %c0_2 = arith.constant 0 : index
    %1 = vector.load %arg2[%c0_1, %c0_2] : memref<128x64xf32, #tpu.memory_space<vmem>>, vector<128x64xf32>
    %c0_3 = arith.constant 0 : index
    %c0_4 = arith.constant 0 : index
    %2 = vector.load %arg3[%c0_3, %c0_4] : memref<1x64xf32, #tpu.memory_space<vmem>>, vector<1x64xf32>
    %cst = arith.constant dense<0.000000e+00> : vector<128x64xf32>
    %3 = tpu.matmul %0, %1, %cst {dimension_numbers = #tpu.dot_dimension_numbers<[1], [0], [0], [1], [0, 0, 1, 1], [], []>} : vector<128x128xf32>, vector<128x64xf32>, vector<128x64xf32> -> vector<128x64xf32>
    %4 = vector.broadcast %2 : vector<1x64xf32> to vector<128x64xf32>
    %5 = arith.addf %3, %4 : vector<128x64xf32>
    %cst_5 = arith.constant 0.000000e+00 : f32
    %6 = vector.broadcast %cst_5 : f32 to vector<128x64xf32>
    %7 = arith.maximumf %5, %6 : vector<128x64xf32>
    %c0_6 = arith.constant 0 : index
    %c0_7 = arith.constant 0 : index
    %8 = vector.load %arg4[%c0_6, %c0_7] : memref<64x32xf32, #tpu.memory_space<vmem>>, vector<64x32xf32>
    %c0_8 = arith.constant 0 : index
    %c0_9 = arith.constant 0 : index
    %9 = vector.load %arg5[%c0_8, %c0_9] : memref<1x32xf32, #tpu.memory_space<vmem>>, vector<1x32xf32>
    %cst_10 = arith.constant dense<0.000000e+00> : vector<128x32xf32>
    %10 = tpu.matmul %7, %8, %cst_10 {dimension_numbers = #tpu.dot_dimension_numbers<[1], [0], [0], [1], [0, 0, 1, 1], [], []>} : vector<128x64xf32>, vector<64x32xf32>, vector<128x32xf32> -> vector<128x32xf32>
    %11 = vector.broadcast %9 : vector<1x32xf32> to vector<128x32xf32>
    %12 = arith.addf %10, %11 : vector<128x32xf32>
    %cst_11 = arith.constant 0.000000e+00 : f32
    %13 = vector.broadcast %cst_11 : f32 to vector<128x32xf32>
    %14 = arith.maximumf %12, %13 : vector<128x32xf32>
    %c0_12 = arith.constant 0 : index
    %c0_13 = arith.constant 0 : index
    %15 = vector.load %arg6[%c0_12, %c0_13] : memref<128x32xf32, #tpu.memory_space<vmem>>, vector<128x32xf32>
    tpu.vector_store %arg6[%c0_12, %c0_13], %14 {strides = array<i32>} : memref<128x32xf32, #tpu.memory_space<vmem>>, vector<128x32xf32>,
    return
  }
  func.func @transform_0(%arg0: i32) -> (i32, i32) {
    %c0_i32 = arith.constant 0 : i32
    %c0_i32_0 = arith.constant 0 : i32
    return %arg0, %c0_i32 : i32, i32
  }
  func.func @transform_1(%arg0: i32) -> (i32, i32) {
    %c0_i32 = arith.constant 0 : i32
    %c0_i32_0 = arith.constant 0 : i32
    %c0_i32_1 = arith.constant 0 : i32
    return %c0_i32, %c0_i32_0 : i32, i32
  }
  func.func @transform_2(%arg0: i32) -> (i32, i32) {
    %c0_i32 = arith.constant 0 : i32
    %c0_i32_0 = arith.constant 0 : i32
    %c0_i32_1 = arith.constant 0 : i32
    return %c0_i32, %c0_i32_0 : i32, i32
  }
  func.func @transform_3(%arg0: i32) -> (i32, i32) {
    %c0_i32 = arith.constant 0 : i32
    %c0_i32_0 = arith.constant 0 : i32
    %c0_i32_1 = arith.constant 0 : i32
    return %c0_i32, %c0_i32_0 : i32, i32
  }
  func.func @transform_4(%arg0: i32) -> (i32, i32) {
    %c0_i32 = arith.constant 0 : i32
    %c0_i32_0 = arith.constant 0 : i32
    %c0_i32_1 = arith.constant 0 : i32
    return %c0_i32, %c0_i32_0 : i32, i32
  }
  func.func @transform_5(%arg0: i32) -> (i32, i32) {
    %c0_i32 = arith.constant 0 : i32
    %c0_i32_0 = arith.constant 0 : i32
    return %arg0, %c0_i32 : i32, i32
  }
}

</mosaic_0001>

<bundles_post_ra>
// kernel: tpu_custom_call.1
= control target key start
LH: loop header
LB: loop body
LE: loop exit
PB: predicated region body
PF: predicated region fallthrough
CT: control target
= control target key end

     0   :  { %s1001_s18 = smov 0   ;;  %s1171_s0 = inlined_call_operand.vmem [shape: f32[256,128], index: 0, kind: input, shape index: {}]   ;;  %s1172_s1 = inlined_call_operand.vmem [shape: f32[128,64], index: 1, kind: input, shape index: {}]   ;;  %s1173_s2 = inlined_call_operand.vmem [shape: f32[1,64], index: 2, kind: input, shape index: {}]   ;;  %s1174_s3 = inlined_call_operand.vmem [shape: f32[64,32], index: 3, kind: input, shape index: {}]   ;;  %s1175_s4 = inlined_call_operand.vmem [shape: f32[1,32], index: 4, kind: input, shape index: {}]   ;;  %s1176_s5 = inlined_call_operand.vmem [shape: f32[256,32], index: 5, kind: output, shape index: {}]  }
   0x1 LB: > { %s726_s19 = sadd.s32 4294967295, %s969_s18   ;;  %p730_p0 = scmp.ge.s32.totalorder %s969_s18, 1  ;;  %s969_s18 = sphi %s1001_s18, %s15_s18  }
   0x2   : > { %p188_p1 = scmp.lt.s32.totalorder %s969_s18, 3 }
   0x4   : > { %p189_p2 = pnand %p730_p0, %p188_p1 }
   0x5   : > { %v244_v0 = vld [vmem:[%s1172_s1] sm:$0xff] (!%p189_p2)  ;;  %v245_v1 = vld [vmem:[%s1172_s1 + $0x8] sm:$0xff] (!%p189_p2)  ;;  %v246_v2 = vld [vmem:[%s1172_s1 + $0x10] sm:$0xff] (!%p189_p2)  ;;  %s731_s26 = sshll.u32 (!%p189_p2), %s726_s19, 4  ;;  %vm443_vm0 = vcmask (!%p189_p2), 523264   ;;  %vm653_vm1 = vcmask (!%p189_p2), 261120  }
   0x6   : > { %192 = sbr.rel (%p189_p2) target bundleno = 504 (0x1f8), region = 40  ;;  %v907_v3 = vpack.c.bf16 (!%p189_p2), %v245_v1, %v244_v0  ;;  %v247_v4 = vld [vmem:[%s1172_s1 + $0x18] sm:$0xff] (!%p189_p2)  ;;  %p217_p3 = scmp.lt.s32.totalorder (!%p189_p2), %s731_s26, 31  ;;  %v248_v6 = vld [vmem:[%s1172_s1 + $0x20] sm:$0xff] (!%p189_p2)  ;;  %v249_v7 = vld [vmem:[%s1172_s1 + $0x28] sm:$0xff] (!%p189_p2) }
   0x7   : > { %v911_v5 = vpack.c.bf16 (!%p189_p2), %v247_v4, %v246_v2  ;;  %v915_v8 = vpack.c.bf16 (!%p189_p2), %v249_v7, %v248_v6  ;;  %v250_v9 = vld [vmem:[%s1172_s1 + $0x30] sm:$0xff] (!%p189_p2)  ;;  %v428_v10 = vld [vmem:[%s1174_s3] sm:$0xff] (!%p189_p2)  ;;  %v429_v11 = vld [vmem:[%s1174_s3 + $0x8] sm:$0xff] (!%p189_p2) }
   0x8   : > { %908 = vmatprep.subr.bf16.mxu0 (!%p189_p2), %v907_v3  ;;  %v251_v12 = vld [vmem:[%s1172_s1 + $0x38] sm:$0xff] (!%p189_p2)  ;;  %v939_v13 = vpack.c.bf16 (!%p189_p2), %v429_v11, %v428_v10  ;;  %v430_v14 = vld [vmem:[%s1174_s3 + $0x10] sm:$0xff] (!%p189_p2)  ;;  %v252_v19 = vld [vmem:[%s1172_s1 + $0x40] sm:$0xff] (!%p189_p2) }
   0x9   : > { %910 = vmatpush3.bf16.msra.mxu0 (!%p189_p2), %v907_v3  ;;  %v431_v15 = vld [vmem:[%s1174_s3 + $0x18] sm:$0xff] (!%p189_p2)  ;;  %v919_v18 = vpack.c.bf16 (!%p189_p2), %v251_v12, %v250_v9  ;;  %v253_v20 = vld [vmem:[%s1172_s1 + $0x48] sm:$0xff] (!%p189_p2)  ;;  %v432_v21 = vld [vmem:[%s1174_s3 + $0x20] sm:$0xff] (!%p189_p2) }
   0xa   : > { %912 = vmatprep.subr.bf16.mxu0 (!%p189_p2), %v911_v5  ;;  %v943_v17 = vpack.c.bf16 (!%p189_p2), %v431_v15, %v430_v14  ;;  %940 = vmatprep.subr.bf16.mxu1 (!%p189_p2), %v939_v13  ;;  %v433_v22 = vld [vmem:[%s1174_s3 + $0x28] sm:$0xff] (!%p189_p2)  ;;  %v923_v23 = vpack.c.bf16 (!%p189_p2), %v253_v20, %v252_v19  ;;  %v254_v25 = vld [vmem:[%s1172_s1 + $0x50] sm:$0xff] (!%p189_p2)  ;;  %v255_v26 = vld [vmem:[%s1172_s1 + $0x58] sm:$0xff] (!%p189_p2) }
   0xb   : > { %942 = vmatpush3.bf16.msra.mxu1 (!%p189_p2), %v939_v13  ;;  %v947_v24 = vpack.c.bf16 (!%p189_p2), %v433_v22, %v432_v21  ;;  %v927_v27 = vpack.c.bf16 (!%p189_p2), %v255_v26, %v254_v25  ;;  %v256_v28 = vld [vmem:[%s1172_s1 + $0x60] sm:$0xff] (!%p189_p2)  ;;  %v257_v29 = vld [vmem:[%s1172_s1 + $0x68] sm:$0xff] (!%p189_p2)  ;;  %v258_v31 = vld [vmem:[%s1172_s1 + $0x70] sm:$0xff] (!%p189_p2) }
   0xc   : > { %944 = vmatprep.subr.bf16.mxu1 (!%p189_p2), %v943_v17  ;;  %v931_v30 = vpack.c.bf16 (!%p189_p2), %v257_v29, %v256_v28  ;;  %v259_v32 = vld [vmem:[%s1172_s1 + $0x78] sm:$0xff] (!%p189_p2)  ;;  %v434_v49 = vld [vmem:[%s1174_s3 + $0x30] sm:$0xff] (!%p189_p2)  ;;  %v735_v52 = vld [vmem:[%s1173_s2] ss:$0 sm:$0xff] (!%p189_p2) }
   0xd   : > { %s1178_s26 = smov (!%p217_p3, %s731_s26), 31  ;;  %914 = vmatpush3.bf16.msra.mxu0 %v911_v5  ;;  %v935_v33 = vpack.c.bf16 %v259_v32, %v258_v31  ;;  %v435_v50 = vld [vmem:[%s1174_s3 + $0x38] sm:$0xff] }
   0xe   : > { %s732_s10 = sshll.u32 %s1178_s26, 3  ;;  %916 = vmatprep.subr.bf16.mxu0 %v915_v8  ;;  %v951_v51 = vpack.c.bf16 %v435_v50, %v434_v49 }
   0xf   : > { %s1047_s20 = scalar_lea.vmem %s1171_s0, %s732_s10  ;;  %946 = vmatpush3.bf16.msra.mxu1 %v943_v17  ;;  %s1134_s9 = scalar_lea.vmem %s1176_s5, %s732_s10 }
  0x10   : > { %v228_v16 = vld [vmem:[%s1047_s20] sm:$0xff]  ;;  %948 = vmatprep.subr.bf16.mxu1 %v947_v24  ;;  %v229_v34 = vld [vmem:[%s1047_s20 + $0x8] sm:$0xff]  ;;  %v230_v35 = vld [vmem:[%s1047_s20 + $0x10] sm:$0xff] }
  0x11   : > { %843 = vmatprep.mubr.f32.mxu0 %v228_v16  ;;  %918 = vmatpush3.bf16.msra.mxu0 %v915_v8  ;;  %v231_v36 = vld [vmem:[%s1047_s20 + $0x18] sm:$0xff]  ;;  %v232_v37 = vld [vmem:[%s1047_s20 + $0x20] sm:$0xff]  ;;  %v233_v38 = vld [vmem:[%s1047_s20 + $0x28] sm:$0xff] }
  0x12   : > { %920 = vmatprep.subr.bf16.mxu0 %v919_v18  ;;  %v234_v39 = vld [vmem:[%s1047_s20 + $0x30] sm:$0xff]  ;;  %v235_v40 = vld [vmem:[%s1047_s20 + $0x38] sm:$0xff]  ;;  %v236_v41 = vld [vmem:[%s1047_s20 + $0x40] sm:$0xff] }
  0x13   : > { %950 = vmatpush3.bf16.msra.mxu1 %v947_v24  ;;  %v237_v42 = vld [vmem:[%s1047_s20 + $0x48] sm:$0xff]  ;;  %v238_v43 = vld [vmem:[%s1047_s20 + $0x50] sm:$0xff]  ;;  %v239_v44 = vld [vmem:[%s1047_s20 + $0x58] sm:$0xff] }
  0x14   : > { %v240_v45 = vld [vmem:[%s1047_s20 + $0x60] sm:$0xff]  ;;  %v241_v46 = vld [vmem:[%s1047_s20 + $0x68] sm:$0xff]  ;;  %v242_v47 = vld [vmem:[%s1047_s20 + $0x70] sm:$0xff]  ;;  %952 = vmatprep.subr.bf16.mxu1 %v951_v51 }
  0x15   : > { %922 = vmatpush3.bf16.msra.mxu0 %v919_v18  ;;  %v243_v48 = vld [vmem:[%s1047_s20 + $0x78] sm:$0xff] }
  0x16   : > { %924 = vmatprep.subr.bf16.mxu0 %v923_v23 }
  0x17   : > { %954 = vmatpush3.bf16.msra.mxu1 %v951_v51 }
  0x19   : > { %926 = vmatpush3.bf16.msra.mxu0 %v923_v23 }
  0x1a   : > { %928 = vmatprep.subr.bf16.mxu0 %v927_v27 }
  0x1d   : > { %930 = vmatpush3.bf16.msra.mxu0 %v927_v27 }
  0x1e   : > { %932 = vmatprep.subr.bf16.mxu0 %v931_v30 }
  0x21   : > { %934 = vmatpush3.bf16.msra.mxu0 %v931_v30 }
  0x22   : > { %936 = vmatprep.subr.bf16.mxu0 %v935_v33 }
  0x25   : > { %938 = vmatpush3.bf16.msra.mxu0 %v935_v33 }
  0x28   : > { %844 = vmatmul.mubr.f32.vlgmr.msra.gmra.mrb[0].mxu0 %v229_v34 }
  0x29   : > { %846 = vmatprep.mubr.f32.mxu0 %v230_v35 }
  0x2c   : > { %847 = vmatmul.mubr.f32.gmra.mrb[2].mxu0 %v231_v36 }
  0x2d   : > { %849 = vmatprep.mubr.f32.mxu0 %v232_v37  ;;  %v736_v37 = vld [vmem:[%s1175_s4] ss:$0 sm:$0xff] }
  0x30   : > { %850 = vmatmul.mubr.f32.gmra.mrb[4].mxu0 %v233_v38 }
  0x31   : > { %852 = vmatprep.mubr.f32.mxu0 %v234_v39 }
  0x34   : > { %853 = vmatmul.mubr.f32.gmra.mrb[6].mxu0 %v235_v40 }
  0x35   : > { %855 = vmatprep.mubr.f32.mxu0 %v236_v41 }
  0x38   : > { %856 = vmatmul.mubr.f32.gmra.mrb[8].mxu0 %v237_v42 }
  0x39   : > { %858 = vmatprep.mubr.f32.mxu0 %v238_v43 }
  0x3c   : > { %859 = vmatmul.mubr.f32.gmra.mrb[10].mxu0 %v239_v44 }
  0x3d   : > { %861 = vmatprep.mubr.f32.mxu0 %v240_v45 }
  0x40   : > { %862 = vmatmul.mubr.f32.gmra.mrb[12].mxu0 %v241_v46 }
  0x41   : > { %864 = vmatprep.mubr.f32.mxu0 %v242_v47 }
  0x44   : > { %865 = vmatmul.mubr.f32.gmra.mrb[14].mxu0 %v243_v48 }
  0xfb   : > { %v845_v53 = vpop.f32.mrb[0].mxu0 }
  0xfc   : > { %v339_v54 = vadd.f32 %v845_v53, %v735_v52  ;;  %v333_v55 = vpop.f32.mrb[1].mxu0 }
  0xfd   : > { %v334_v56 = vadd.f32 %v735_v52, %v333_v55 }
  0xfe   : > { %v413_v59 = vmax.f32 %v339_v54, 0.0 }
  0xff   : > { %v412_v57 = vmax.f32 %v334_v56, 0.0  ;;  %v848_v58 = vpop.f32.mrb[2].mxu0 }
 0x100   : > { %v349_v60 = vadd.f32 %v848_v58, %v735_v52  ;;  %v343_v61 = vpop.f32.mrb[3].mxu0 }
 0x101   : > { %v344_v62 = vadd.f32 %v735_v52, %v343_v61  ;;  %883 = vmatprep.mubr.msk.f32.mxu1 %vm443_vm0, %v412_v57 }
 0x102   : > { %884 = vmatmul.mubr.msk.f32.vlgmr.msra.gmra.mrb[0].mxu1 %vm443_vm0, %v413_v59  ;;  %v415_v1 = vmax.f32 %v349_v60, 0.0 }
 0x103   : > { %v414_v63 = vmax.f32 %v344_v62, 0.0  ;;  %v851_v0 = vpop.f32.mrb[4].mxu0 }
 0x104   : > { %v359_v2 = vadd.f32 %v851_v0, %v735_v52  ;;  %v353_v3 = vpop.f32.mrb[5].mxu0 }
 0x105   : > { %v354_v4 = vadd.f32 %v735_v52, %v353_v3  ;;  %886 = vmatprep.mubr.msk.f32.mxu1 %vm443_vm0, %v414_v63 }
 0x106   : > { %887 = vmatmul.mubr.msk.f32.gmra.mrb[2].mxu1 %vm443_vm0, %v415_v1  ;;  %v417_v7 = vmax.f32 %v359_v2, 0.0 }
 0x107   : > { %v416_v5 = vmax.f32 %v354_v4, 0.0  ;;  %v854_v6 = vpop.f32.mrb[6].mxu0 }
 0x108   : > { %v369_v8 = vadd.f32 %v854_v6, %v735_v52  ;;  %v363_v9 = vpop.f32.mrb[7].mxu0 }
 0x109   : > { %v364_v10 = vadd.f32 %v735_v52, %v363_v9  ;;  %889 = vmatprep.mubr.msk.f32.mxu1 %vm443_vm0, %v416_v5 }
 0x10a   : > { %890 = vmatmul.mubr.msk.f32.gmra.mrb[4].mxu1 %vm443_vm0, %v417_v7  ;;  %v419_v13 = vmax.f32 %v369_v8, 0.0 }
 0x10b   : > { %v418_v11 = vmax.f32 %v364_v10, 0.0  ;;  %v857_v12 = vpop.f32.mrb[8].mxu0 }
 0x10c   : > { %v379_v14 = vadd.f32 %v857_v12, %v735_v52  ;;  %v373_v15 = vpop.f32.mrb[9].mxu0 }
 0x10d   : > { %v374_v16 = vadd.f32 %v735_v52, %v373_v15  ;;  %892 = vmatprep.mubr.msk.f32.mxu1 %vm443_vm0, %v418_v11 }
 0x10e   : > { %893 = vmatmul.mubr.msk.f32.gmra.mrb[6].mxu1 %vm443_vm0, %v419_v13  ;;  %v421_v19 = vmax.f32 %v379_v14, 0.0 }
 0x10f   : > { %v420_v17 = vmax.f32 %v374_v16, 0.0  ;;  %v860_v18 = vpop.f32.mrb[10].mxu0 }
 0x110   : > { %v389_v20 = vadd.f32 %v860_v18, %v735_v52  ;;  %v383_v21 = vpop.f32.mrb[11].mxu0 }
 0x111   : > { %v384_v22 = vadd.f32 %v735_v52, %v383_v21  ;;  %895 = vmatprep.mubr.msk.f32.mxu1 %vm443_vm0, %v420_v17 }
 0x112   : > { %896 = vmatmul.mubr.msk.f32.gmra.mrb[8].mxu1 %vm443_vm0, %v421_v19  ;;  %v423_v25 = vmax.f32 %v389_v20, 0.0 }
 0x113   : > { %v422_v23 = vmax.f32 %v384_v22, 0.0  ;;  %v863_v24 = vpop.f32.mrb[12].mxu0 }
 0x114   : > { %v399_v26 = vadd.f32 %v863_v24, %v735_v52  ;;  %v393_v27 = vpop.f32.mrb[13].mxu0 }
 0x115   : > { %v394_v28 = vadd.f32 %v735_v52, %v393_v27  ;;  %898 = vmatprep.mubr.msk.f32.mxu1 %vm443_vm0, %v422_v23 }
 0x116   : > { %899 = vmatmul.mubr.msk.f32.gmra.mrb[10].mxu1 %vm443_vm0, %v423_v25  ;;  %v425_v31 = vmax.f32 %v399_v26, 0.0 }
 0x117   : > { %v424_v29 = vmax.f32 %v394_v28, 0.0  ;;  %v866_v30 = vpop.f32.mrb[14].mxu0 }
 0x118   : > { %v409_v32 = vadd.f32 %v866_v30, %v735_v52  ;;  %v403_v33 = vpop.f32.mrb[15].mxu0 }
 0x119   : > { %v404_v34 = vadd.f32 %v735_v52, %v403_v33  ;;  %901 = vmatprep.mubr.msk.f32.mxu1 %vm443_vm0, %v424_v29 }
 0x11a   : > { %902 = vmatmul.mubr.msk.f32.gmra.mrb[12].mxu1 %vm443_vm0, %v425_v31  ;;  %v427_v36 = vmax.f32 %v409_v32, 0.0 }
 0x11b   : > { %v426_v35 = vmax.f32 %v404_v34, 0.0 }
 0x11d   : > { %904 = vmatprep.mubr.msk.f32.mxu1 %vm443_vm0, %v426_v35 }
 0x11e   : > { %905 = vmatmul.mubr.msk.f32.gmra.mrb[14].mxu1 %vm443_vm0, %v427_v36 }
 0x1d5   : > { %v885_v38 = vpop.f32.mrb[0].mxu1 }
 0x1d6   : > { %v564_v39 = vadd.f32 %v885_v38, %v736_v37  ;;  %v558_v40 = vpop.f32.mrb[1].mxu1 }
 0x1d7   : > { %v559_v41 = vadd.f32 %v736_v37, %v558_v40 }
 0x1d8   : > { %v638_v42 = vmax.f32 %v564_v39, 0.0 }
 0x1d9   : > { %v637_v43 = vmax.f32 %v559_v41, 0.0  ;;  %v888_v44 = vpop.f32.mrb[2].mxu1 }
 0x1da   : > { %655 = vst.msk [vmem:[%s1134_s9 + $0x8] sm:$0xff] %vm653_vm1, %v638_v42  ;;  %v574_v45 = vadd.f32 %v888_v44, %v736_v37  ;;  %v568_v46 = vpop.f32.mrb[3].mxu1 }
 0x1db   : > { %654 = vst.msk [vmem:[%s1134_s9] sm:$0xff] %vm653_vm1, %v637_v43  ;;  %v569_v47 = vadd.f32 %v736_v37, %v568_v46 }
 0x1dc   : > { %v640_v48 = vmax.f32 %v574_v45, 0.0 }
 0x1dd   : > { %v639_v49 = vmax.f32 %v569_v47, 0.0  ;;  %v891_v50 = vpop.f32.mrb[4].mxu1 }
 0x1de   : > { %657 = vst.msk [vmem:[%s1134_s9 + $0x18] sm:$0xff] %vm653_vm1, %v640_v48  ;;  %v584_v51 = vadd.f32 %v891_v50, %v736_v37  ;;  %v578_v52 = vpop.f32.mrb[5].mxu1 }
 0x1df   : > { %656 = vst.msk [vmem:[%s1134_s9 + $0x10] sm:$0xff] %vm653_vm1, %v639_v49  ;;  %v579_v53 = vadd.f32 %v736_v37, %v578_v52 }
 0x1e0   : > { %v642_v54 = vmax.f32 %v584_v51, 0.0 }
 0x1e1   : > { %v641_v55 = vmax.f32 %v579_v53, 0.0  ;;  %v894_v56 = vpop.f32.mrb[6].mxu1 }
 0x1e2   : > { %659 = vst.msk [vmem:[%s1134_s9 + $0x28] sm:$0xff] %vm653_vm1, %v642_v54  ;;  %v594_v57 = vadd.f32 %v894_v56, %v736_v37  ;;  %v588_v58 = vpop.f32.mrb[7].mxu1 }
 0x1e3   : > { %658 = vst.msk [vmem:[%s1134_s9 + $0x20] sm:$0xff] %vm653_vm1, %v641_v55  ;;  %v589_v59 = vadd.f32 %v736_v37, %v588_v58 }
 0x1e4   : > { %v644_v60 = vmax.f32 %v594_v57, 0.0 }
 0x1e5   : > { %v643_v61 = vmax.f32 %v589_v59, 0.0  ;;  %v897_v62 = vpop.f32.mrb[8].mxu1 }
 0x1e6   : > { %661 = vst.msk [vmem:[%s1134_s9 + $0x38] sm:$0xff] %vm653_vm1, %v644_v60  ;;  %v604_v63 = vadd.f32 %v897_v62, %v736_v37  ;;  %v598_v0 = vpop.f32.mrb[9].mxu1 }
 0x1e7   : > { %660 = vst.msk [vmem:[%s1134_s9 + $0x30] sm:$0xff] %vm653_vm1, %v643_v61  ;;  %v599_v1 = vadd.f32 %v736_v37, %v598_v0 }
 0x1e8   : > { %v646_v2 = vmax.f32 %v604_v63, 0.0 }
 0x1e9   : > { %v645_v3 = vmax.f32 %v599_v1, 0.0  ;;  %v900_v4 = vpop.f32.mrb[10].mxu1 }
 0x1ea   : > { %663 = vst.msk [vmem:[%s1134_s9 + $0x48] sm:$0xff] %vm653_vm1, %v646_v2  ;;  %v614_v5 = vadd.f32 %v900_v4, %v736_v37  ;;  %v608_v6 = vpop.f32.mrb[11].mxu1 }
 0x1eb   : > { %662 = vst.msk [vmem:[%s1134_s9 + $0x40] sm:$0xff] %vm653_vm1, %v645_v3  ;;  %v609_v7 = vadd.f32 %v736_v37, %v608_v6 }
 0x1ec   : > { %v648_v8 = vmax.f32 %v614_v5, 0.0 }
 0x1ed   : > { %v647_v9 = vmax.f32 %v609_v7, 0.0  ;;  %v903_v10 = vpop.f32.mrb[12].mxu1 }
 0x1ee   : > { %665 = vst.msk [vmem:[%s1134_s9 + $0x58] sm:$0xff] %vm653_vm1, %v648_v8  ;;  %v624_v11 = vadd.f32 %v903_v10, %v736_v37  ;;  %v618_v12 = vpop.f32.mrb[13].mxu1 }
 0x1ef   : > { %664 = vst.msk [vmem:[%s1134_s9 + $0x50] sm:$0xff] %vm653_vm1, %v647_v9  ;;  %v619_v13 = vadd.f32 %v736_v37, %v618_v12 }
 0x1f0   : > { %v650_v14 = vmax.f32 %v624_v11, 0.0 }
 0x1f1   : > { %v649_v15 = vmax.f32 %v619_v13, 0.0  ;;  %v906_v16 = vpop.f32.mrb[14].mxu1 }
 0x1f2   : > { %667 = vst.msk [vmem:[%s1134_s9 + $0x68] sm:$0xff] %vm653_vm1, %v650_v14  ;;  %v634_v17 = vadd.f32 %v906_v16, %v736_v37  ;;  %v628_v18 = vpop.f32.mrb[15].mxu1 }
 0x1f3   : > { %666 = vst.msk [vmem:[%s1134_s9 + $0x60] sm:$0xff] %vm653_vm1, %v649_v15  ;;  %v629_v19 = vadd.f32 %v736_v37, %v628_v18 }
 0x1f4   : > { %v652_v20 = vmax.f32 %v634_v17, 0.0 }
 0x1f5   : > { %v651_v21 = vmax.f32 %v629_v19, 0.0 }
 0x1f6   : > { %669 = vst.msk [vmem:[%s1134_s9 + $0x78] sm:$0xff] %vm653_vm1, %v652_v20 }
 0x1f7   : > { %668 = vst.msk [vmem:[%s1134_s9 + $0x70] sm:$0xff] %vm653_vm1, %v651_v21 }
 0x1f8 PF: > { %s15_s18 = sadd.s32 1, %s969_s18  }
 0x1f9   : > { %p12_p4 = scmp.ge.s32.totalorder %s15_s18, 4  }
 0x1fb   :  { %14 = sbr.rel (!%p12_p4) target bundleno = 1 (0x1), region = 70 }

</bundles_post_ra>
